<compile_context>
chip_gen: v7x
topology: tpu7x:2x2x1
jax: 0.10.0
libtpu: 0.0.40
codegen_flags: <defaults>
</compile_context>

<pallas_src>
import functools

import jax
import jax.numpy as jnp
from jax import lax
from jax.experimental import pallas as pl
from jax.experimental.pallas import tpu as pltpu

BN_EPS = 1e-5
D_IN = 50          # real input features
D_OUT = 10         # real output features
H = 512            # hidden width
K_PAD = 128        # padded input-feature dim  (50 -> 128)
N_PAD = 128        # padded output dim         (10 -> 128)

# 32 MiB: above v5e's 16 MiB scoped default, equal to v6e/v7x defaults, and
# comfortably below physical VMEM on every generation.
VMEM_LIMIT_BYTES = 32 * 1024 * 1024


# --------------------------------------------------------------------------
# Parameter preparation (done ONCE, outside the per-call path)
# --------------------------------------------------------------------------
def prepare_params(p):
    """PyTorch-layout params ([out,in] weights) -> padded / transposed / cast."""
    w1 = (jnp.zeros((K_PAD, H), jnp.float32)
          .at[:D_IN, :].set(p["w1"].T)).astype(jnp.bfloat16)          # [128,512] bf16
    b1 = p["b1"].reshape(1, H).astype(jnp.float32)
    w2 = p["w2"].T.astype(jnp.bfloat16)                                # [512,512] bf16
    b2 = p["b2"].reshape(1, H).astype(jnp.float32)
    gamma = p["gamma"].reshape(1, H).astype(jnp.float32)
    beta = p["beta"].reshape(1, H).astype(jnp.float32)
    w3 = (jnp.zeros((H, N_PAD), jnp.float32)
          .at[:, :D_OUT].set(p["w3"].T)).astype(jnp.bfloat16)          # [512,128] bf16
    b3 = (jnp.zeros((1, N_PAD), jnp.float32)
          .at[:, :D_OUT].set(p["b3"].reshape(1, -1)))
    return (w1, b1, w2, b2, gamma, beta, w3, b3)


def _pad_cast_x(x, b_pad):
    """[B,50] f32 -> [b_pad,128] bf16 (zero-padded); pad+cast fuse in XLA."""
    B = x.shape[0]
    x_pad = jnp.zeros((b_pad, K_PAD), jnp.bfloat16)
    return x_pad.at[:B, :D_IN].set(x.astype(jnp.bfloat16))


# --------------------------------------------------------------------------
# Fused single-block kernel (small batch: whole forward in one pallas_call)
# --------------------------------------------------------------------------
def _fused_mlp_kernel(x_ref, w1_ref, b1_ref, w2_ref, b2_ref,
                      gamma_ref, beta_ref, w3_ref, b3_ref, out_ref):
    B = x_ref.shape[0]

    # layer1 + ReLU (bf16 MXU inputs, f32 accumulate)
    h1 = jnp.dot(x_ref[...], w1_ref[...], preferred_element_type=jnp.float32)
    h1 = jnp.maximum(h1 + b1_ref[...], 0.0)                             # [B,512]

    # layer2
    h2 = jnp.dot(h1.astype(jnp.bfloat16), w2_ref[...],
                 preferred_element_type=jnp.float32) + b2_ref[...]      # [B,512]

    # BatchNorm1d (training mode), single pass: E[x], E[x^2] -> scale/shift
    inv_b = 1.0 / B
    s = jnp.sum(h2, axis=0, keepdims=True)                              # [1,512]
    ss = jnp.sum(h2 * h2, axis=0, keepdims=True)                        # [1,512]
    mean = s * inv_b
    var = ss * inv_b - mean * mean                                      # biased var
    scale = gamma_ref[...] * lax.rsqrt(var + BN_EPS)
    shift = beta_ref[...] - mean * scale

    # normalize + ReLU: one FMA per element
    h = jnp.maximum(h2 * scale + shift, 0.0)

    # layer3: bf16 MXU inputs, f32 accumulate, lane-dense padded output
    out_ref[...] = jnp.dot(h.astype(jnp.bfloat16), w3_ref[...],
                           preferred_element_type=jnp.float32) + b3_ref[...]


@jax.jit
def mlp_forward_fused(x, prepared):
    """x: [B, 50] f32, small B (single VMEM block).  Returns [B, 10] f32."""
    B = x.shape[0]
    x_pad = _pad_cast_x(x, B)
    vmem = pl.BlockSpec(memory_space=pltpu.MemorySpace.VMEM)
    out_pad = pl.pallas_call(
        _fused_mlp_kernel,
        out_shape=jax.ShapeDtypeStruct((B, N_PAD), jnp.float32),
        in_specs=[vmem] * 9,
        out_specs=vmem,
        compiler_params=pltpu.CompilerParams(vmem_limit_bytes=VMEM_LIMIT_BYTES),
    )(x_pad, *prepared)
    return out_pad[:, :D_OUT]


# --------------------------------------------------------------------------
# Batch-tiled path (large B):
#   pass 1 = per-tile BN partial stats only (no h2 writeback),
#   pass 2 = recompute h1/h2 from x, normalize, ReLU, head.
# --------------------------------------------------------------------------
def _hidden_stats_kernel(x_ref, w1_ref, b1_ref, w2_ref, b2_ref, stats_ref,
                         *, tile_b, b_true, need_mask):
    h1 = jnp.dot(x_ref[...], w1_ref[...], preferred_element_type=jnp.float32)
    h1 = jnp.maximum(h1 + b1_ref[...], 0.0)
    h2 = jnp.dot(h1.astype(jnp.bfloat16), w2_ref[...],
                 preferred_element_type=jnp.float32) + b2_ref[...]      # [tile_b,512] f32
    if need_mask:
        # zero out padded rows so they do not corrupt the full-batch BN stats
        row0 = pl.program_id(0) * tile_b
        rows = row0 + lax.broadcasted_iota(jnp.int32, (tile_b, 1), 0)
        h2 = jnp.where(rows < b_true, h2, 0.0)
    # direct row stores (no concatenate -> no extra sublane relayout)
    stats_ref[0:1, :] = jnp.sum(h2, axis=0, keepdims=True)
    stats_ref[1:2, :] = jnp.sum(h2 * h2, axis=0, keepdims=True)


def _recompute_bn_head_kernel(x_ref, w1_ref, b1_ref, w2_ref, b2_ref,
                              scale_ref, shift_ref, w3_ref, b3_ref, out_ref):
    # recompute h1/h2 (cheaper than an f32 h2 HBM round-trip on v6e/v7x)
    h1 = jnp.dot(x_ref[...], w1_ref[...], preferred_element_type=jnp.float32)
    h1 = jnp.maximum(h1 + b1_ref[...], 0.0)
    h2 = jnp.dot(h1.astype(jnp.bfloat16), w2_ref[...],
                 preferred_element_type=jnp.float32) + b2_ref[...]
    h = jnp.maximum(h2 * scale_ref[...] + shift_ref[...], 0.0)
    out_ref[...] = jnp.dot(h.astype(jnp.bfloat16), w3_ref[...],
                           preferred_element_type=jnp.float32) + b3_ref[...]


@functools.partial(jax.jit, static_argnames=("tile_b",))
def mlp_forward_tiled(x, prepared, *, tile_b=512):
    """Grid over batch; BN statistics reduced over the full (true) batch.
    Handles B not divisible by tile_b by masking padded rows out of the stats.
    """
    w1, b1, w2, b2, gamma, beta, w3, b3 = prepared
    B = x.shape[0]
    n_tiles = pl.cdiv(B, tile_b)
    b_pad = n_tiles * tile_b
    x_pad = _pad_cast_x(x, b_pad)

    cp = pltpu.CompilerParams(dimension_semantics=("parallel",),
                              vmem_limit_bytes=VMEM_LIMIT_BYTES)

    # ---- pass 1: per-tile partial sums / sums-of-squares of h2 ------------
    stats_kernel = functools.partial(
        _hidden_stats_kernel, tile_b=tile_b, b_true=B, need_mask=(b_pad != B))
    stats = pl.pallas_call(
        stats_kernel,
        out_shape=jax.ShapeDtypeStruct((n_tiles, 2, H), jnp.float32),
        grid=(n_tiles,),
        in_specs=[
            pl.BlockSpec((tile_b, K_PAD), lambda i: (i, 0)),
            pl.BlockSpec((K_PAD, H), lambda i: (0, 0)),     # weights stay resident
            pl.BlockSpec((1, H), lambda i: (0, 0)),
            pl.BlockSpec((H, H), lambda i: (0, 0)),
            pl.BlockSpec((1, H), lambda i: (0, 0)),
        ],
        out_specs=pl.BlockSpec((None, 2, H), lambda i: (i, 0, 0)),
        compiler_params=cp,
    )(x_pad, w1, b1, w2, b2)

    # ---- tiny full-batch stats combine (on [512] vectors), divisor = true B
    total = jnp.sum(stats, axis=0)                                      # [2,512]
    mean = total[0] / B
    var = total[1] / B - mean * mean
    scale = (gamma[0] * lax.rsqrt(var + BN_EPS)).reshape(1, H)
    shift = (beta[0] - mean * scale[0]).reshape(1, H)

    # ---- pass 2: recompute hidden, normalize + ReLU + head -----------------
    out_pad = pl.pallas_call(
        _recompute_bn_head_kernel,
        out_shape=jax.ShapeDtypeStruct((b_pad, N_PAD), jnp.float32),
        grid=(n_tiles,),
        in_specs=[
            pl.BlockSpec((tile_b, K_PAD), lambda i: (i, 0)),
            pl.BlockSpec((K_PAD, H), lambda i: (0, 0)),
            pl.BlockSpec((1, H), lambda i: (0, 0)),
            pl.BlockSpec((H, H), lambda i: (0, 0)),
            pl.BlockSpec((1, H), lambda i: (0, 0)),
            pl.BlockSpec((1, H), lambda i: (0, 0)),
            pl.BlockSpec((1, H), lambda i: (0, 0)),
            pl.BlockSpec((H, N_PAD), lambda i: (0, 0)),
            pl.BlockSpec((1, N_PAD), lambda i: (0, 0)),
        ],
        out_specs=pl.BlockSpec((tile_b, N_PAD), lambda i: (i, 0)),
        compiler_params=cp,
    )(x_pad, w1, b1, w2, b2, scale, shift, w3, b3)
    return out_pad[:B, :D_OUT]


# --------------------------------------------------------------------------
# Init + pure-JAX reference (PyTorch semantics, f32)
# --------------------------------------------------------------------------
def init_params(key):
    ks = jax.random.split(key, 6)

    def linear(kw, kb, fan_in, fan_out):
        bound = 1.0 / jnp.sqrt(fan_in)
        w = jax.random.uniform(kw, (fan_out, fan_in), jnp.float32, -bound, bound)
        b = jax.random.uniform(kb, (fan_out,), jnp.float32, -bound, bound)
        return w, b

    w1, b1 = linear(ks[0], ks[1], D_IN, H)
    w2, b2 = linear(ks[2], ks[3], H, H)
    w3, b3 = linear(ks[4], ks[5], H, D_OUT)
    gamma = jnp.ones((H,), jnp.float32)
    beta = jnp.zeros((H,), jnp.float32)
    return dict(w1=w1, b1=b1, w2=w2, b2=b2, w3=w3, b3=b3, gamma=gamma, beta=beta)


def reference_forward(x, p):
    h = jnp.maximum(x @ p["w1"].T + p["b1"], 0.0)
    h = h @ p["w2"].T + p["b2"]
    mean = jnp.mean(h, axis=0, keepdims=True)
    var = jnp.mean((h - mean) ** 2, axis=0, keepdims=True)
    h = (h - mean) * lax.rsqrt(var + BN_EPS) * p["gamma"] + p["beta"]
    h = jnp.maximum(h, 0.0)
    return h @ p["w3"].T + p["b3"]


if __name__ == "__main__":
    key = jax.random.PRNGKey(0)
    kx1, kx2, kx3, kp = jax.random.split(key, 4)

    params = init_params(kp)
    prepared = prepare_params(params)   # transpose/pad/bf16-cast hoisted, done once

    # Tolerance loosened vs. the f32 reference because all three matmuls run
    # with bf16 MXU inputs (f32 accumulate); typical max-abs error is ~1e-2.
    ATOL = RTOL = 5e-2

    # --- small-batch fused path -------------------------------------------
    B = 16
    x = jax.random.normal(kx1, (B, D_IN), jnp.float32)
    out = jax.block_until_ready(mlp_forward_fused(x, prepared))
    ref = reference_forward(x, params)
    assert out.shape == (B, D_OUT)
    assert jnp.allclose(out, ref, atol=ATOL, rtol=RTOL), "fused path mismatch"

    # --- batch-tiled path: 2 tiles of 512 (shards across both TCs on v7x) ---
    B2, TILE_B = 1024, 512
    x2 = jax.random.normal(kx2, (B2, D_IN), jnp.float32)
    out2 = jax.block_until_ready(mlp_forward_tiled(x2, prepared, tile_b=TILE_B))
    ref2 = reference_forward(x2, params)
    assert out2.shape == (B2, D_OUT)
    assert jnp.allclose(out2, ref2, atol=ATOL, rtol=RTOL), "tiled path mismatch"

    # --- ragged batch: exercises padded-row masking in the BN statistics ----
    B3 = 700
    x3 = jax.random.normal(kx3, (B3, D_IN), jnp.float32)
    out3 = jax.block_until_ready(mlp_forward_tiled(x3, prepared, tile_b=TILE_B))
    ref3 = reference_forward(x3, params)
    assert out3.shape == (B3, D_OUT)
    assert jnp.allclose(out3, ref3, atol=ATOL, rtol=RTOL), "masked-stats mismatch"

    print("KERNEL_OK")
</pallas_src>

<mosaic_0001>
module attributes {stable_mosaic.version = 11 : i64} {
  func.func @_fused_mlp_kernel(%arg0: memref<16x128xbf16, #tpu.memory_space<vmem>>, %arg1: memref<128x512xbf16, #tpu.memory_space<vmem>>, %arg2: memref<1x512xf32, #tpu.memory_space<vmem>>, %arg3: memref<512x512xbf16, #tpu.memory_space<vmem>>, %arg4: memref<1x512xf32, #tpu.memory_space<vmem>>, %arg5: memref<1x512xf32, #tpu.memory_space<vmem>>, %arg6: memref<1x512xf32, #tpu.memory_space<vmem>>, %arg7: memref<512x128xbf16, #tpu.memory_space<vmem>>, %arg8: memref<1x128xf32, #tpu.memory_space<vmem>>, %arg9: memref<16x128xf32, #tpu.memory_space<vmem>>) attributes {dimension_semantics = [], scalar_prefetch = 0 : i64, scratch_operands = 0 : i64, tpu.core_type = #tpu.core_type<tc>} {
    %c0 = arith.constant 0 : index
    %c0_0 = arith.constant 0 : index
    %0 = vector.load %arg0[%c0, %c0_0] : memref<16x128xbf16, #tpu.memory_space<vmem>>, vector<16x128xbf16>
    %c0_1 = arith.constant 0 : index
    %c0_2 = arith.constant 0 : index
    %1 = vector.load %arg1[%c0_1, %c0_2] : memref<128x512xbf16, #tpu.memory_space<vmem>>, vector<128x512xbf16>
    %cst = arith.constant dense<0.000000e+00> : vector<16x512xf32>
    %2 = tpu.matmul %0, %1, %cst {dimension_numbers = #tpu.dot_dimension_numbers<[1], [0], [0], [1], [0, 0, 1, 1], [], []>} : vector<16x128xbf16>, vector<128x512xbf16>, vector<16x512xf32> -> vector<16x512xf32>
    %c0_3 = arith.constant 0 : index
    %c0_4 = arith.constant 0 : index
    %3 = vector.load %arg2[%c0_3, %c0_4] : memref<1x512xf32, #tpu.memory_space<vmem>>, vector<1x512xf32>
    %4 = vector.broadcast %3 : vector<1x512xf32> to vector<16x512xf32>
    %5 = arith.addf %2, %4 : vector<16x512xf32>
    %cst_5 = arith.constant 0.000000e+00 : f32
    %6 = vector.broadcast %cst_5 : f32 to vector<16x512xf32>
    %7 = arith.maximumf %5, %6 : vector<16x512xf32>
    %8 = arith.truncf %7 : vector<16x512xf32> to vector<16x512xbf16>
    %c0_6 = arith.constant 0 : index
    %c0_7 = arith.constant 0 : index
    %9 = vector.load %arg3[%c0_6, %c0_7] : memref<512x512xbf16, #tpu.memory_space<vmem>>, vector<512x512xbf16>
    %cst_8 = arith.constant dense<0.000000e+00> : vector<16x512xf32>
    %10 = tpu.matmul %8, %9, %cst_8 {dimension_numbers = #tpu.dot_dimension_numbers<[1], [0], [0], [1], [0, 0, 1, 1], [], []>} : vector<16x512xbf16>, vector<512x512xbf16>, vector<16x512xf32> -> vector<16x512xf32>
    %c0_9 = arith.constant 0 : index
    %c0_10 = arith.constant 0 : index
    %11 = vector.load %arg4[%c0_9, %c0_10] : memref<1x512xf32, #tpu.memory_space<vmem>>, vector<1x512xf32>
    %12 = vector.broadcast %11 : vector<1x512xf32> to vector<16x512xf32>
    %13 = arith.addf %10, %12 : vector<16x512xf32>
    %cst_11 = arith.constant dense<0.000000e+00> : vector<512xf32>
    %14 = vector.multi_reduction <add>, %13, %cst_11 [0] : vector<16x512xf32> to vector<512xf32>
    %15 = vector.shape_cast %14 : vector<512xf32> to vector<1x512xf32>
    %16 = arith.mulf %13, %13 : vector<16x512xf32>
    %cst_12 = arith.constant dense<0.000000e+00> : vector<512xf32>
    %17 = vector.multi_reduction <add>, %16, %cst_12 [0] : vector<16x512xf32> to vector<512xf32>
    %18 = vector.shape_cast %17 : vector<512xf32> to vector<1x512xf32>
    %cst_13 = arith.constant 6.250000e-02 : f32
    %19 = vector.broadcast %cst_13 : f32 to vector<1x512xf32>
    %20 = arith.mulf %15, %19 : vector<1x512xf32>
    %cst_14 = arith.constant 6.250000e-02 : f32
    %21 = vector.broadcast %cst_14 : f32 to vector<1x512xf32>
    %22 = arith.mulf %18, %21 : vector<1x512xf32>
    %23 = arith.mulf %20, %20 : vector<1x512xf32>
    %24 = arith.subf %22, %23 : vector<1x512xf32>
    %c0_15 = arith.constant 0 : index
    %c0_16 = arith.constant 0 : index
    %25 = vector.load %arg5[%c0_15, %c0_16] : memref<1x512xf32, #tpu.memory_space<vmem>>, vector<1x512xf32>
    %cst_17 = arith.constant 9.99999974E-6 : f32
    %26 = vector.broadcast %cst_17 : f32 to vector<1x512xf32>
    %27 = arith.addf %24, %26 : vector<1x512xf32>
    %28 = math.rsqrt %27 : vector<1x512xf32>
    %29 = arith.mulf %25, %28 : vector<1x512xf32>
    %c0_18 = arith.constant 0 : index
    %c0_19 = arith.constant 0 : index
    %30 = vector.load %arg6[%c0_18, %c0_19] : memref<1x512xf32, #tpu.memory_space<vmem>>, vector<1x512xf32>
    %31 = arith.mulf %20, %29 : vector<1x512xf32>
    %32 = arith.subf %30, %31 : vector<1x512xf32>
    %33 = vector.broadcast %29 : vector<1x512xf32> to vector<16x512xf32>
    %34 = arith.mulf %13, %33 : vector<16x512xf32>
    %35 = vector.broadcast %32 : vector<1x512xf32> to vector<16x512xf32>
    %36 = arith.addf %34, %35 : vector<16x512xf32>
    %cst_20 = arith.constant 0.000000e+00 : f32
    %37 = vector.broadcast %cst_20 : f32 to vector<16x512xf32>
    %38 = arith.maximumf %36, %37 : vector<16x512xf32>
    %39 = arith.truncf %38 : vector<16x512xf32> to vector<16x512xbf16>
    %c0_21 = arith.constant 0 : index
    %c0_22 = arith.constant 0 : index
    %40 = vector.load %arg7[%c0_21, %c0_22] : memref<512x128xbf16, #tpu.memory_space<vmem>>, vector<512x128xbf16>
    %cst_23 = arith.constant dense<0.000000e+00> : vector<16x128xf32>
    %41 = tpu.matmul %39, %40, %cst_23 {dimension_numbers = #tpu.dot_dimension_numbers<[1], [0], [0], [1], [0, 0, 1, 1], [], []>} : vector<16x512xbf16>, vector<512x128xbf16>, vector<16x128xf32> -> vector<16x128xf32>
    %c0_24 = arith.constant 0 : index
    %c0_25 = arith.constant 0 : index
    %42 = vector.load %arg8[%c0_24, %c0_25] : memref<1x128xf32, #tpu.memory_space<vmem>>, vector<1x128xf32>
    %43 = vector.broadcast %42 : vector<1x128xf32> to vector<16x128xf32>
    %44 = arith.addf %41, %43 : vector<16x128xf32>
    %c0_26 = arith.constant 0 : index
    %c0_27 = arith.constant 0 : index
    %45 = vector.load %arg9[%c0_26, %c0_27] : memref<16x128xf32, #tpu.memory_space<vmem>>, vector<16x128xf32>
    tpu.vector_store %arg9[%c0_26, %c0_27], %44 {strides = array<i32>} : memref<16x128xf32, #tpu.memory_space<vmem>>, vector<16x128xf32>,
    return
  }
}

</mosaic_0001>

<bundles_post_ra>
// kernel: mlp_forward_fused.1
= control target key start
LH: loop header
LB: loop body
LE: loop exit
PB: predicated region body
PF: predicated region fallthrough
CT: control target
= control target key end

     0   :  { %14 = vsyncpa [#allocation3], 0  ;;  %s2805_s0 = inlined_call_operand.vmem [shape: bf16[16,128], index: 0, kind: input, shape index: {}]   ;;  %s2806_s1 = inlined_call_operand.hbm [shape: bf16[128,512], index: 1, kind: input, shape index: {}]   ;;  %s2807_s2 = inlined_call_operand.vmem [shape: f32[1,512], index: 2, kind: input, shape index: {}]   ;;  %s2808_s3 = inlined_call_operand.hbm [shape: bf16[512,512], index: 3, kind: input, shape index: {}]   ;;  %s2809_s4 = inlined_call_operand.vmem [shape: f32[1,512], index: 4, kind: input, shape index: {}]   ;;  %s2810_s5 = inlined_call_operand.vmem [shape: f32[1,512], index: 5, kind: input, shape index: {}]   ;;  %s2811_s6 = inlined_call_operand.vmem [shape: f32[1,512], index: 6, kind: input, shape index: {}]   ;;  %s2812_s7 = inlined_call_operand.hbm [shape: bf16[512,128], index: 7, kind: input, shape index: {}]   ;;  %s2813_s8 = inlined_call_operand.vmem [shape: f32[1,128], index: 8, kind: input, shape index: {}]   ;;  %s2814_s9 = inlined_call_operand.hbm [shape: f32[16,128], index: 9, kind: output, shape index: {}]  }
   0x1   :  { %15 = vsyncpa [#allocation6], 0 }
   0x2   :  { %16 = vsyncpa [#allocation4], 0  ;;  %s2587_s30 = smov [#allocation5]   ;;  %s2588_s11 = smov [#allocation2]  }
   0x3   :  { %s38_s10 = sshll.u32 %s2587_s30, 4  ;;  %s24_s12 = sshll.u32 %s2588_s11, 4  ;;  %s39_s10 = int_to_ptr.vmem [resolvable:$true] %s38_s10  ;;  %s2649_s12 = int_to_ptr.vmem [resolvable:$true] %s24_s12 }
   0x4   :  { %s2493_s15 = scalar_lea.hbm %s2808_s3, 16384 }
   0x5   :  { %p2494_p0 = scmp.ne.s32.totalorder %s2808_s3, %s2493_s15  ;;  %p2497_p1 = scmp.lt.u32.totalorder %s2493_s15, %s2808_s3 }
   0x7   :  { %p2499_p2 = pnand %p2497_p1, %p2494_p0 }
   0x9   :  { %2502 = shalt.err (!%p2499_p2)
}
   0xa   :  { %s2503_s20 = scalar_lea.vmem %s39_s10, 16384  ;;  %p2508_p4 = scmp.lt.s32.totalorder %s39_s10, %s39_s10 }
   0xb   :  { %p2504_p3 = scmp.ne.s32.totalorder %s39_s10, %s2503_s20  ;;  %p2509_p5 = scmp.lt.s32.totalorder %s2503_s20, %s2503_s20 }
   0xd   :  { %p2510_p6 = por %p2509_p5, %p2508_p4 }
   0xf   :  { %p2511_p7 = pnand %p2510_p6, %p2504_p3 }
  0x11   :  { %2514 = shalt.err (!%p2511_p7)
}
  0x12   :  { %s2589_s21 = smov 256   ;;  %s2590_s22 = smov 16  }
  0x13   :  { %44 = dma.hbm_to_vmem [thread:$0]  %s2808_s3, 16384, %s39_s10, [#allocation6], %s2589_s21, %s2589_s21, %s2590_s22  }
  0x14   :  { %s2515_s27 = scalar_lea.hbm %s2806_s1, 4096 }
  0x15   :  { %p2516_p8 = scmp.ne.s32.totalorder %s2806_s1, %s2515_s27  ;;  %p2519_p9 = scmp.lt.u32.totalorder %s2515_s27, %s2806_s1 }
  0x17   :  { %p2521_p10 = pnand %p2519_p9, %p2516_p8 }
  0x19   :  { %2524 = shalt.err (!%p2521_p10)
}
  0x1a   :  { %s2525_s13 = scalar_lea.vmem %s2649_s12, 4096  ;;  %p2530_p12 = scmp.lt.s32.totalorder %s2649_s12, %s2649_s12 }
  0x1b   :  { %p2526_p11 = scmp.ne.s32.totalorder %s2649_s12, %s2525_s13  ;;  %p2531_p13 = scmp.lt.s32.totalorder %s2525_s13, %s2525_s13 }
  0x1d   :  { %p2532_p0 = por %p2531_p13, %p2530_p12 }
  0x1f   :  { %p2533_p1 = pnand %p2532_p0, %p2526_p11 }
  0x21   :  { %2536 = shalt.err (!%p2533_p1)
}
  0x22   :  { %30 = dma.hbm_to_vmem [thread:$0]  %s2806_s1, 4096, %s2649_s12, [#allocation3], %s2589_s21, %s2589_s21, %s2590_s22  }
  0x23   :  { %s2591_s14 = smov [#allocation7]   ;;  %s2537_s18 = scalar_lea.hbm %s2812_s7, 4096 }
  0x24   :  { %s56_s15 = sshll.u32 %s2591_s14, 4  ;;  %p2538_p2 = scmp.ne.s32.totalorder %s2812_s7, %s2537_s18  ;;  %s57_s15 = int_to_ptr.vmem [resolvable:$true] %s56_s15 }
  0x25   :  { %p2541_p3 = scmp.lt.u32.totalorder %s2537_s18, %s2812_s7 }
  0x27   :  { %p2543_p4 = pnand %p2541_p3, %p2538_p2 }
  0x29   :  { %2546 = shalt.err (!%p2543_p4)
}
  0x2a   :  { %s2547_s25 = scalar_lea.vmem %s57_s15, 4096  ;;  %p2552_p6 = scmp.lt.s32.totalorder %s57_s15, %s57_s15 }
  0x2b   :  { %p2548_p5 = scmp.ne.s32.totalorder %s57_s15, %s2547_s25  ;;  %p2553_p7 = scmp.lt.s32.totalorder %s2547_s25, %s2547_s25 }
  0x2d   :  { %p2554_p8 = por %p2553_p7, %p2552_p6 }
  0x2f   :  { %p2555_p9 = pnand %p2554_p8, %p2548_p5 }
  0x31   :  { %2558 = shalt.err (!%p2555_p9)
}
  0x32   :  { %s2592_s1 = smov 64   ;;  %s2593_s12 = smov 4  }
  0x33   :  { %62 = dma.hbm_to_vmem [thread:$0]  %s2812_s7, 4096, %s57_s15, [#allocation6], %s2592_s1, %s2592_s1, %s2593_s12  }
  0x34   :  { %2581 = dma.done.wait [#allocation3], 4096  }
  0x35   :  { %2582 = vsyncadd [#allocation3], 4294963200 }
  0x36   :  { %2583 = dma.done.wait [#allocation6], 20480  }
  0x37   :  { %2584 = vsyncadd [#allocation6], 4294946816  ;;  %v2594_v0 = vmov 0   ;;  %v2212_v1 = vld [vmem:[#allocation2 + $0x4] ss:$16 sps:$4 sm:$0xff]   ;;  %s2596_s13 = smov [#allocation8]  }
  0x38   :  { %329 = vmatprep.mubr.bf16.mxu0 %v2594_v0  ;;  %372 = vmatprep.mubr.bf16.mxu1 %v2594_v0  ;;  %v2214_v2 = vld [vmem:[#allocation2] ss:$16 sps:$4 sm:$0xff]   ;;  %v2215_v3 = vld [vmem:[#allocation2 + $0x24] ss:$16 sps:$4 sm:$0xff]   ;;  %v2237_v10 = vld [vmem:[#allocation2 + $0xc] ss:$16 sps:$4 sm:$0xff]  }
  0x39   :  { %297 = vmatprep.subr.bf16.mxu0 %v2212_v1  ;;  %v2217_v4 = vld [vmem:[#allocation2 + $0x20] ss:$16 sps:$4 sm:$0xff]   ;;  %v2218_v5 = vld [vmem:[#allocation2 + $0x44] ss:$16 sps:$4 sm:$0xff]   ;;  %v2239_v11 = vld [vmem:[#allocation2 + $0x8] ss:$16 sps:$4 sm:$0xff]   ;;  %340 = vmatprep.subr.bf16.mxu1 %v2237_v10 }
  0x3a   :  { %298 = vmatpush1.bf16.msra.mxu0 %v2214_v2  ;;  %v2220_v6 = vld [vmem:[#allocation2 + $0x40] ss:$16 sps:$4 sm:$0xff]   ;;  %v2221_v7 = vld [vmem:[#allocation2 + $0x64] ss:$16 sps:$4 sm:$0xff]   ;;  %v2240_v12 = vld [vmem:[#allocation2 + $0x2c] ss:$16 sps:$4 sm:$0xff]   ;;  %341 = vmatpush1.bf16.msra.mxu1 %v2239_v11 }
  0x3b   :  { %299 = vmatprep.subr.bf16.mxu0 %v2215_v3  ;;  %v2223_v8 = vld [vmem:[#allocation2 + $0x60] ss:$16 sps:$4 sm:$0xff]   ;;  %v2224_v9 = vld [vmem:[#allocation2 + $0x84] ss:$16 sps:$4 sm:$0xff]   ;;  %v2242_v14 = vld [vmem:[#allocation2 + $0x28] ss:$16 sps:$4 sm:$0xff]   ;;  %342 = vmatprep.subr.bf16.mxu1 %v2240_v12 }
  0x3c   :  { %v2226_v13 = vld [vmem:[#allocation2 + $0x80] ss:$16 sps:$4 sm:$0xff]   ;;  %v2227_v15 = vld [vmem:[#allocation2 + $0xa4] ss:$16 sps:$4 sm:$0xff]   ;;  %v2243_v16 = vld [vmem:[#allocation2 + $0x4c] ss:$16 sps:$4 sm:$0xff]  }
  0x3d   :  { %v2229_v17 = vld [vmem:[#allocation2 + $0xa0] ss:$16 sps:$4 sm:$0xff]   ;;  %v2245_v18 = vld [vmem:[#allocation2 + $0x48] ss:$16 sps:$4 sm:$0xff]   ;;  %v2230_v19 = vld [vmem:[#allocation2 + $0xc4] ss:$16 sps:$4 sm:$0xff]  }
  0x3e   :  { %300 = vmatpush1.bf16.msra.mxu0 %v2217_v4  ;;  %343 = vmatpush1.bf16.msra.mxu1 %v2242_v14  ;;  %v2246_v20 = vld [vmem:[#allocation2 + $0x6c] ss:$16 sps:$4 sm:$0xff]   ;;  %v2232_v21 = vld [vmem:[#allocation2 + $0xc0] ss:$16 sps:$4 sm:$0xff]   ;;  %v2248_v22 = vld [vmem:[#allocation2 + $0x68] ss:$16 sps:$4 sm:$0xff]  }
  0x3f   :  { %301 = vmatprep.subr.bf16.mxu0 %v2218_v5  ;;  %344 = vmatprep.subr.bf16.mxu1 %v2243_v16  ;;  %v2233_v23 = vld [vmem:[#allocation2 + $0xe4] ss:$16 sps:$4 sm:$0xff]   ;;  %v2249_v24 = vld [vmem:[#allocation2 + $0x8c] ss:$16 sps:$4 sm:$0xff]   ;;  %v2235_v25 = vld [vmem:[#allocation2 + $0xe0] ss:$16 sps:$4 sm:$0xff]  }
  0x40   :  { %v2251_v26 = vld [vmem:[#allocation2 + $0x88] ss:$16 sps:$4 sm:$0xff]   ;;  %v2252_v27 = vld [vmem:[#allocation2 + $0xac] ss:$16 sps:$4 sm:$0xff]   ;;  %v2263_v28 = vld [vmem:[#allocation5 + $0x4] ss:$16 sps:$4 sm:$0xff]  }
  0x41   :  { %v2236_v29 = vld [vmem:[%s2805_s0] sm:$0xff]   ;;  %v2254_v30 = vld [vmem:[#allocation2 + $0xa8] ss:$16 sps:$4 sm:$0xff]   ;;  %v2255_v32 = vld [vmem:[#allocation2 + $0xcc] ss:$16 sps:$4 sm:$0xff]   ;;  %s1933_s3 = sshll.u32 %s2596_s13, 4  ;;  %s1934_s3 = int_to_ptr.vmem [resolvable:$true] %s1933_s3 }
  0x42   :  { %302 = vmatpush1.bf16.msra.mxu0 %v2220_v6  ;;  %345 = vmatpush1.bf16.msra.mxu1 %v2245_v18  ;;  %v2261_v31 = vld [vmem:[#allocation5] ss:$16 sps:$4 sm:$0xff]   ;;  %v2269_v33 = vld [vmem:[#allocation5 + $0x24] ss:$16 sps:$4 sm:$0xff]   ;;  %v2257_v34 = vld [vmem:[#allocation2 + $0xc8] ss:$16 sps:$4 sm:$0xff]   ;;  %p2564_p11 = scmp.lt.s32.totalorder %s1934_s3, %s1934_s3 }
  0x43   :  { %303 = vmatprep.subr.bf16.mxu0 %v2221_v7  ;;  %346 = vmatprep.subr.bf16.mxu1 %v2246_v20  ;;  %v2267_v35 = vld [vmem:[#allocation5 + $0x20] ss:$16 sps:$4 sm:$0xff]   ;;  %v2258_v36 = vld [vmem:[#allocation2 + $0xec] ss:$16 sps:$4 sm:$0xff]   ;;  %v2275_v37 = vld [vmem:[#allocation5 + $0x44] ss:$16 sps:$4 sm:$0xff]  }
  0x44   :  { %v2260_v38 = vld [vmem:[#allocation2 + $0xe8] ss:$16 sps:$4 sm:$0xff]   ;;  %v2273_v39 = vld [vmem:[#allocation5 + $0x40] ss:$16 sps:$4 sm:$0xff]   ;;  %v2266_v40 = vld [vmem:[#allocation5 + $0xc] ss:$16 sps:$4 sm:$0xff]  }
  0x45   :  { %v2281_v41 = vld [vmem:[#allocation5 + $0x64] ss:$16 sps:$4 sm:$0xff]   ;;  %v2264_v42 = vld [vmem:[#allocation5 + $0x8] ss:$16 sps:$4 sm:$0xff]   ;;  %v2279_v43 = vld [vmem:[#allocation5 + $0x60] ss:$16 sps:$4 sm:$0xff]  }
  0x46   :  { %304 = vmatpush1.bf16.msra.mxu0 %v2223_v8  ;;  %347 = vmatpush1.bf16.msra.mxu1 %v2248_v22  ;;  %v2272_v44 = vld [vmem:[#allocation5 + $0x2c] ss:$16 sps:$4 sm:$0xff]   ;;  %v2287_v45 = vld [vmem:[#allocation5 + $0x84] ss:$16 sps:$4 sm:$0xff]   ;;  %v2270_v46 = vld [vmem:[#allocation5 + $0x28] ss:$16 sps:$4 sm:$0xff]  }
  0x47   :  { %305 = vmatprep.subr.bf16.mxu0 %v2224_v9  ;;  %348 = vmatprep.subr.bf16.mxu1 %v2249_v24  ;;  %v2285_v47 = vld [vmem:[#allocation5 + $0x80] ss:$16 sps:$4 sm:$0xff]   ;;  %v2278_v48 = vld [vmem:[#allocation5 + $0x4c] ss:$16 sps:$4 sm:$0xff]   ;;  %v2293_v49 = vld [vmem:[#allocation5 + $0xa4] ss:$16 sps:$4 sm:$0xff]  }
  0x48   :  { %v2276_v50 = vld [vmem:[#allocation5 + $0x48] ss:$16 sps:$4 sm:$0xff]   ;;  %v2291_v51 = vld [vmem:[#allocation5 + $0xa0] ss:$16 sps:$4 sm:$0xff]   ;;  %v2284_v52 = vld [vmem:[#allocation5 + $0x6c] ss:$16 sps:$4 sm:$0xff]  }
  0x49   :  { %v2299_v53 = vld [vmem:[#allocation5 + $0xc4] ss:$16 sps:$4 sm:$0xff]   ;;  %v2282_v54 = vld [vmem:[#allocation5 + $0x68] ss:$16 sps:$4 sm:$0xff]   ;;  %v2297_v55 = vld [vmem:[#allocation5 + $0xc0] ss:$16 sps:$4 sm:$0xff]  }
  0x4a   :  { %306 = vmatpush1.bf16.msra.mxu0 %v2226_v13  ;;  %349 = vmatpush1.bf16.msra.mxu1 %v2251_v26  ;;  %v2290_v56 = vld [vmem:[#allocation5 + $0x8c] ss:$16 sps:$4 sm:$0xff]   ;;  %v2305_v57 = vld [vmem:[#allocation5 + $0xe4] ss:$16 sps:$4 sm:$0xff]   ;;  %v2288_v58 = vld [vmem:[#allocation5 + $0x88] ss:$16 sps:$4 sm:$0xff]  }
  0x4b   :  { %307 = vmatprep.subr.bf16.mxu0 %v2227_v15  ;;  %350 = vmatprep.subr.bf16.mxu1 %v2252_v27  ;;  %v2296_v59 = vld [vmem:[#allocation5 + $0xac] ss:$16 sps:$4 sm:$0xff]   ;;  %v2303_v60 = vld [vmem:[#allocation5 + $0xe0] ss:$16 sps:$4 sm:$0xff]   ;;  %v2311_v61 = vld [vmem:[#allocation5 + $0x104] ss:$16 sps:$4 sm:$0xff]  }
  0x4c   :  { %v2294_v62 = vld [vmem:[#allocation5 + $0xa8] ss:$16 sps:$4 sm:$0xff]   ;;  %v2309_v63 = vld [vmem:[#allocation5 + $0x100] ss:$16 sps:$4 sm:$0xff]   ;;  %v2302_v0 = vld [vmem:[#allocation5 + $0xcc] ss:$16 sps:$4 sm:$0xff]  }
  0x4d   :  { %v2317_v1 = vld [vmem:[#allocation5 + $0x124] ss:$16 sps:$4 sm:$0xff]   ;;  %v2300_v2 = vld [vmem:[#allocation5 + $0xc8] ss:$16 sps:$4 sm:$0xff]   ;;  %v2315_v3 = vld [vmem:[#allocation5 + $0x120] ss:$16 sps:$4 sm:$0xff]  }
  0x4e   :  { %308 = vmatpush1.bf16.msra.mxu0 %v2229_v17  ;;  %351 = vmatpush1.bf16.msra.mxu1 %v2254_v30  ;;  %v2308_v4 = vld [vmem:[#allocation5 + $0xec] ss:$16 sps:$4 sm:$0xff]   ;;  %v2323_v5 = vld [vmem:[#allocation5 + $0x144] ss:$16 sps:$4 sm:$0xff]   ;;  %v2306_v6 = vld [vmem:[#allocation5 + $0xe8] ss:$16 sps:$4 sm:$0xff]  }
  0x4f   :  { %309 = vmatprep.subr.bf16.mxu0 %v2230_v19  ;;  %352 = vmatprep.subr.bf16.mxu1 %v2255_v32  ;;  %v2321_v7 = vld [vmem:[#allocation5 + $0x140] ss:$16 sps:$4 sm:$0xff]   ;;  %v2314_v8 = vld [vmem:[#allocation5 + $0x10c] ss:$16 sps:$4 sm:$0xff]   ;;  %v2329_v9 = vld [vmem:[#allocation5 + $0x164] ss:$16 sps:$4 sm:$0xff]  }
  0x50   :  { %v2312_v10 = vld [vmem:[#allocation5 + $0x108] ss:$16 sps:$4 sm:$0xff]   ;;  %v2327_v11 = vld [vmem:[#allocation5 + $0x160] ss:$16 sps:$4 sm:$0xff]   ;;  %v2320_v12 = vld [vmem:[#allocation5 + $0x12c] ss:$16 sps:$4 sm:$0xff]  }
  0x51   :  { %v2335_v13 = vld [vmem:[#allocation5 + $0x184] ss:$16 sps:$4 sm:$0xff]   ;;  %v2318_v14 = vld [vmem:[#allocation5 + $0x128] ss:$16 sps:$4 sm:$0xff]   ;;  %v2333_v15 = vld [vmem:[#allocation5 + $0x180] ss:$16 sps:$4 sm:$0xff]  }
  0x52   :  { %310 = vmatpush1.bf16.msra.mxu0 %v2232_v21  ;;  %353 = vmatpush1.bf16.msra.mxu1 %v2257_v34  ;;  %v2326_v16 = vld [vmem:[#allocation5 + $0x14c] ss:$16 sps:$4 sm:$0xff]   ;;  %v2341_v17 = vld [vmem:[#allocation5 + $0x1a4] ss:$16 sps:$4 sm:$0xff]   ;;  %v2324_v18 = vld [vmem:[#allocation5 + $0x148] ss:$16 sps:$4 sm:$0xff]  }
  0x53   :  { %311 = vmatprep.subr.bf16.mxu0 %v2233_v23  ;;  %354 = vmatprep.subr.bf16.mxu1 %v2258_v36  ;;  %v2339_v19 = vld [vmem:[#allocation5 + $0x1a0] ss:$16 sps:$4 sm:$0xff]   ;;  %v2332_v20 = vld [vmem:[#allocation5 + $0x16c] ss:$16 sps:$4 sm:$0xff]   ;;  %v2330_v21 = vld [vmem:[#allocation5 + $0x168] ss:$16 sps:$4 sm:$0xff]   ;;  %v111_v36 = vlaneseq }
  0x54   :  { %v2338_v22 = vld [vmem:[#allocation5 + $0x18c] ss:$16 sps:$4 sm:$0xff]   ;;  %v2336_v23 = vld [vmem:[#allocation5 + $0x188] ss:$16 sps:$4 sm:$0xff]   ;;  %v2347_v26 = vld [vmem:[#allocation5 + $0x1c4] ss:$16 sps:$4 sm:$0xff]  }
  0x55   :  { %v2344_v24 = vld [vmem:[#allocation5 + $0x1ac] ss:$16 sps:$4 sm:$0xff]   ;;  %v2353_v30 = vld [vmem:[#allocation5 + $0x1e4] ss:$16 sps:$4 sm:$0xff]   ;;  %v2351_v32 = vld [vmem:[#allocation5 + $0x1e0] ss:$16 sps:$4 sm:$0xff]  }
  0x56   :  { %312 = vmatpush1.bf16.msra.mxu0 %v2235_v25  ;;  %355 = vmatpush1.bf16.msra.mxu1 %v2260_v38  ;;  %v2342_v25 = vld [vmem:[#allocation5 + $0x1a8] ss:$16 sps:$4 sm:$0xff]   ;;  %v2350_v27 = vld [vmem:[#allocation5 + $0x1cc] ss:$16 sps:$4 sm:$0xff]   ;;  %v2359_v34 = vld [vmem:[#allocation5 + $0x204] ss:$16 sps:$4 sm:$0xff]  }
  0x57   :  { %1185 = vmatprep.subr.bf16.mxu0 %v2263_v28  ;;  %1271 = vmatprep.subr.bf16.mxu1 %v2266_v40  ;;  %v2345_v28 = vld [vmem:[#allocation5 + $0x1c0] ss:$16 sps:$4 sm:$0xff]  }
  0x59   :  { %330 = vmatmul.mubr.bf16.vlgmr.msra.gmra.mrb[0].mxu0 %v2236_v29  ;;  %373 = vmatmul.mubr.bf16.vlgmr.msra.gmra.mrb[0].mxu1 %v2236_v29  ;;  %v2348_v29 = vld [vmem:[#allocation5 + $0x1c8] ss:$16 sps:$4 sm:$0xff]  }
  0x5a   :  { %1186 = vmatpush1.bf16.msra.mxu0 %v2261_v31  ;;  %1272 = vmatpush1.bf16.msra.mxu1 %v2264_v42  ;;  %v2356_v31 = vld [vmem:[#allocation5 + $0x1ec] ss:$16 sps:$4 sm:$0xff]  }
  0x5b   :  { %1187 = vmatprep.subr.bf16.mxu0 %v2269_v33  ;;  %1273 = vmatprep.subr.bf16.mxu1 %v2272_v44  ;;  %v2354_v33 = vld [vmem:[#allocation5 + $0x1e8] ss:$16 sps:$4 sm:$0xff]  }
  0x5e   :  { %1188 = vmatpush1.bf16.msra.mxu0 %v2267_v35  ;;  %1274 = vmatpush1.bf16.msra.mxu1 %v2270_v46  ;;  %v2362_v35 = vld [vmem:[#allocation5 + $0x20c] ss:$16 sps:$4 sm:$0xff]  }
  0x5f   :  { %1189 = vmatprep.subr.bf16.mxu0 %v2275_v37  ;;  %1275 = vmatprep.subr.bf16.mxu1 %v2278_v48  ;;  %v2695_v37 = vshrl.u32 %v111_v36, 7  ;;  %v2396_v36 = vld [vmem:[#allocation5 + $0x2c8] ss:$16 sps:$4 sm:$0xff]  }
  0x61   :  { %v2698_v38 = vsub.s32 0, %v2695_v37  ;;  %v2704_v40 = vsub.s32 1, %v2695_v37 }
  0x62   :  { %1190 = vmatpush1.bf16.msra.mxu0 %v2273_v39  ;;  %1276 = vmatpush1.bf16.msra.mxu1 %v2276_v50  ;;  %v109_v39 = vld [vmem:[%s2807_s2] sm:$0xf] }
  0x63   :  { %1191 = vmatprep.subr.bf16.mxu0 %v2281_v41  ;;  %1277 = vmatprep.subr.bf16.mxu1 %v2284_v52  ;;  %v114_v41 = vrot.slane %v109_v39, %v2698_v38  ;;  %v118_v42 = vrot.slane %v109_v39, %v2704_v40 }
  0x66   :  { %1192 = vmatpush1.bf16.msra.mxu0 %v2279_v43  ;;  %1278 = vmatpush1.bf16.msra.mxu1 %v2282_v54 }
  0x67   :  { %1193 = vmatprep.subr.bf16.mxu0 %v2287_v45  ;;  %1279 = vmatprep.subr.bf16.mxu1 %v2290_v56  ;;  %v2712_v56 = vsub.s32 3, %v2695_v37 }
  0x6a   :  { %1194 = vmatpush1.bf16.msra.mxu0 %v2285_v47  ;;  %1280 = vmatpush1.bf16.msra.mxu1 %v2288_v58 }
  0x6b   :  { %1195 = vmatprep.subr.bf16.mxu0 %v2293_v49  ;;  %1281 = vmatprep.subr.bf16.mxu1 %v2296_v59  ;;  %v2357_v59 = vld [vmem:[#allocation5 + $0x200] ss:$16 sps:$4 sm:$0xff]  }
  0x6e   :  { %1196 = vmatpush1.bf16.msra.mxu0 %v2291_v51  ;;  %1282 = vmatpush1.bf16.msra.mxu1 %v2294_v62  ;;  %v2368_v62 = vld [vmem:[#allocation5 + $0x22c] ss:$16 sps:$4 sm:$0xff]  }
  0x6f   :  { %1197 = vmatprep.subr.bf16.mxu0 %v2299_v53  ;;  %1283 = vmatprep.subr.bf16.mxu1 %v2302_v0  ;;  %v2709_v53 = vsub.s32 2, %v2695_v37  ;;  %v126_v0 = vrot.slane %v109_v39, %v2712_v56 }
  0x72   :  { %1198 = vmatpush1.bf16.msra.mxu0 %v2297_v55  ;;  %1284 = vmatpush1.bf16.msra.mxu1 %v2300_v2  ;;  %v2366_v2 = vld [vmem:[#allocation5 + $0x228] ss:$16 sps:$4 sm:$0xff]  }
  0x73   :  { %1199 = vmatprep.subr.bf16.mxu0 %v2305_v57  ;;  %1285 = vmatprep.subr.bf16.mxu1 %v2308_v4  ;;  %v2371_v4 = vld [vmem:[#allocation5 + $0x244] ss:$16 sps:$4 sm:$0xff]  }
  0x76   :  { %1200 = vmatpush1.bf16.msra.mxu0 %v2303_v60  ;;  %1286 = vmatpush1.bf16.msra.mxu1 %v2306_v6  ;;  %v2360_v60 = vld [vmem:[#allocation5 + $0x208] ss:$16 sps:$4 sm:$0xff]  }
  0x77   :  { %1201 = vmatprep.subr.bf16.mxu0 %v2311_v61  ;;  %1287 = vmatprep.subr.bf16.mxu1 %v2314_v8  ;;  %v2365_v61 = vld [vmem:[#allocation5 + $0x224] ss:$16 sps:$4 sm:$0xff]  }
  0x7a   :  { %1202 = vmatpush1.bf16.msra.mxu0 %v2309_v63  ;;  %1288 = vmatpush1.bf16.msra.mxu1 %v2312_v10  ;;  %v122_v63 = vrot.slane %v109_v39, %v2709_v53  ;;  %v2401_v39 = vld [vmem:[#allocation5 + $0x2e4] ss:$16 sps:$4 sm:$0xff]  }
  0x7b   :  { %1203 = vmatprep.subr.bf16.mxu0 %v2317_v1  ;;  %1289 = vmatprep.subr.bf16.mxu1 %v2320_v12  ;;  %v2363_v1 = vld [vmem:[#allocation5 + $0x220] ss:$16 sps:$4 sm:$0xff]  }
  0x7e   :  { %1204 = vmatpush1.bf16.msra.mxu0 %v2315_v3  ;;  %1290 = vmatpush1.bf16.msra.mxu1 %v2318_v14  ;;  %v2372_v14 = vld [vmem:[#allocation5 + $0x248] ss:$16 sps:$4 sm:$0xff]  }
  0x7f   :  { %1205 = vmatprep.subr.bf16.mxu0 %v2323_v5  ;;  %1291 = vmatprep.subr.bf16.mxu1 %v2326_v16  ;;  %v2374_v5 = vld [vmem:[#allocation5 + $0x24c] ss:$16 sps:$4 sm:$0xff]  }
  0x82   :  { %1206 = vmatpush1.bf16.msra.mxu0 %v2321_v7  ;;  %1292 = vmatpush1.bf16.msra.mxu1 %v2324_v18  ;;  %v2380_v18 = vld [vmem:[#allocation5 + $0x26c] ss:$16 sps:$4 sm:$0xff]  }
  0x83   :  { %1207 = vmatprep.subr.bf16.mxu0 %v2329_v9  ;;  %1293 = vmatprep.subr.bf16.mxu1 %v2332_v20 }
  0x86   :  { %1208 = vmatpush1.bf16.msra.mxu0 %v2327_v11  ;;  %1294 = vmatpush1.bf16.msra.mxu1 %v2330_v21 }
  0x87   :  { %1209 = vmatprep.subr.bf16.mxu0 %v2335_v13  ;;  %1295 = vmatprep.subr.bf16.mxu1 %v2338_v22  ;;  %v2369_v13 = vld [vmem:[#allocation5 + $0x240] ss:$16 sps:$4 sm:$0xff]  }
  0x88   :  { %v2375_v22 = vld [vmem:[#allocation5 + $0x260] ss:$16 sps:$4 sm:$0xff]  }
  0x8a   :  { %1210 = vmatpush1.bf16.msra.mxu0 %v2333_v15  ;;  %1296 = vmatpush1.bf16.msra.mxu1 %v2336_v23  ;;  %v2378_v23 = vld [vmem:[#allocation5 + $0x268] ss:$16 sps:$4 sm:$0xff]  }
  0x8b   :  { %1211 = vmatprep.subr.bf16.mxu0 %v2341_v17  ;;  %1297 = vmatprep.subr.bf16.mxu1 %v2344_v24  ;;  %v2377_v17 = vld [vmem:[#allocation5 + $0x264] ss:$16 sps:$4 sm:$0xff]  }
  0x8e   :  { %1212 = vmatpush1.bf16.msra.mxu0 %v2339_v19  ;;  %1298 = vmatpush1.bf16.msra.mxu1 %v2342_v25  ;;  %v2383_v25 = vld [vmem:[#allocation5 + $0x284] ss:$16 sps:$4 sm:$0xff]  }
  0x8f   :  { %1213 = vmatprep.subr.bf16.mxu0 %v2347_v26  ;;  %1299 = vmatprep.subr.bf16.mxu1 %v2350_v27  ;;  %v2386_v26 = vld [vmem:[#allocation5 + $0x28c] ss:$16 sps:$4 sm:$0xff]   ;;  %v2381_v27 = vld [vmem:[#allocation5 + $0x280] ss:$16 sps:$4 sm:$0xff]  }
  0x92   :  { %1214 = vmatpush1.bf16.msra.mxu0 %v2345_v28  ;;  %1300 = vmatpush1.bf16.msra.mxu1 %v2348_v29  ;;  %v2384_v28 = vld [vmem:[#allocation5 + $0x288] ss:$16 sps:$4 sm:$0xff]   ;;  %v2389_v29 = vld [vmem:[#allocation5 + $0x2a4] ss:$16 sps:$4 sm:$0xff]  }
  0x93   :  { %1215 = vmatprep.subr.bf16.mxu0 %v2353_v30  ;;  %1301 = vmatprep.subr.bf16.mxu1 %v2356_v31  ;;  %v2392_v30 = vld [vmem:[#allocation5 + $0x2ac] ss:$16 sps:$4 sm:$0xff]   ;;  %v2387_v31 = vld [vmem:[#allocation5 + $0x2a0] ss:$16 sps:$4 sm:$0xff]  }
  0x96   :  { %1216 = vmatpush1.bf16.msra.mxu0 %v2351_v32  ;;  %1302 = vmatpush1.bf16.msra.mxu1 %v2354_v33  ;;  %v2390_v32 = vld [vmem:[#allocation5 + $0x2a8] ss:$16 sps:$4 sm:$0xff]   ;;  %v2395_v33 = vld [vmem:[#allocation5 + $0x2c4] ss:$16 sps:$4 sm:$0xff]  }
  0x97   :  { %1228 = vmatprep.subr.bf16.mxu0 %v2359_v34  ;;  %1314 = vmatprep.subr.bf16.mxu1 %v2362_v35  ;;  %v2398_v34 = vld [vmem:[#allocation5 + $0x2cc] ss:$16 sps:$4 sm:$0xff]   ;;  %v2393_v35 = vld [vmem:[#allocation5 + $0x2c0] ss:$16 sps:$4 sm:$0xff]  }
 0x12c   :  { %v331_v43 = vpop.f32.mrb[0].mxu0  ;;  %v374_v3 = vpop.f32.mrb[0].mxu1 }
 0x12d   :  { %v332_v44 = vadd.f32 %v331_v43, %v114_v41  ;;  %v333_v45 = vpop.f32.mrb[1].mxu0  ;;  %v375_v6 = vadd.f32 %v374_v3, %v122_v63  ;;  %v376_v7 = vpop.f32.mrb[1].mxu1  ;;  %v2402_v43 = vld [vmem:[#allocation5 + $0x2e8] ss:$16 sps:$4 sm:$0xff]   ;;  %v2440_v3 = vld [vmem:[#allocation5 + $0x3ac] ss:$16 sps:$4 sm:$0xff]  }
 0x12e   :  { %v334_v46 = vadd.f32 %v333_v45, %v118_v42  ;;  %v335_v47 = vpop.f32.mrb[2].mxu0  ;;  %v377_v8 = vadd.f32 %v376_v7, %v126_v0  ;;  %v378_v9 = vpop.f32.mrb[2].mxu1  ;;  %v2410_v45 = vld [vmem:[#allocation5 + $0x30c] ss:$16 sps:$4 sm:$0xff]  }
 0x12f   :  { %v336_v48 = vadd.f32 %v335_v47, %v114_v41  ;;  %v337_v49 = vpop.f32.mrb[3].mxu0  ;;  %v383_v51 = vmax.f32 %v332_v44, 0.0  ;;  %v385_v10 = vmax.f32 %v375_v6, 0.0  ;;  %v379_v11 = vadd.f32 %v378_v9, %v122_v63  ;;  %v380_v12 = vpop.f32.mrb[3].mxu1  ;;  %v2404_v41 = vld [vmem:[#allocation5 + $0x2ec] ss:$16 sps:$4 sm:$0xff]  }
 0x130   :  { %v338_v50 = vadd.f32 %v337_v49, %v118_v42  ;;  %v384_v54 = vmax.f32 %v334_v46, 0.0  ;;  %v386_v15 = vmax.f32 %v377_v8, 0.0  ;;  %v381_v16 = vadd.f32 %v380_v12, %v126_v0  ;;  %v2399_v42 = vld [vmem:[#allocation5 + $0x2e0] ss:$16 sps:$4 sm:$0xff]   ;;  %v2407_v44 = vld [vmem:[#allocation5 + $0x304] ss:$16 sps:$4 sm:$0xff]  }
 0x131   :  { %v387_v52 = vmax.f32 %v336_v48, 0.0  ;;  %v389_v19 = vmax.f32 %v379_v11, 0.0  ;;  %v2405_v46 = vld [vmem:[#allocation5 + $0x300] ss:$16 sps:$4 sm:$0xff]   ;;  %v2408_v47 = vld [vmem:[#allocation5 + $0x308] ss:$16 sps:$4 sm:$0xff]  }
 0x132   :  { %v388_v55 = vmax.f32 %v338_v50, 0.0  ;;  %v390_v20 = vmax.f32 %v381_v16, 0.0  ;;  %v2413_v48 = vld [vmem:[#allocation5 + $0x324] ss:$16 sps:$4 sm:$0xff]   ;;  %v2416_v49 = vld [vmem:[#allocation5 + $0x32c] ss:$16 sps:$4 sm:$0xff]  }
 0x133   :  { %v391_v57 = vpack.c.bf16 %v387_v52, %v383_v51  ;;  %v2716_v21 = vpack.c.bf16 %v389_v19, %v385_v10  ;;  %v2411_v50 = vld [vmem:[#allocation5 + $0x320] ss:$16 sps:$4 sm:$0xff]   ;;  %v2414_v51 = vld [vmem:[#allocation5 + $0x328] ss:$16 sps:$4 sm:$0xff]   ;;  %v2419_v52 = vld [vmem:[#allocation5 + $0x344] ss:$16 sps:$4 sm:$0xff]  }
 0x134   :  { %v392_v58 = vpack.c.bf16 %v388_v55, %v384_v54  ;;  %v394_v24 = vpack.c.bf16 %v390_v20, %v386_v15  ;;  %v2422_v54 = vld [vmem:[#allocation5 + $0x34c] ss:$16 sps:$4 sm:$0xff]   ;;  %v2417_v55 = vld [vmem:[#allocation5 + $0x340] ss:$16 sps:$4 sm:$0xff]   ;;  %v2443_v6 = vld [vmem:[#allocation5 + $0x3c4] ss:$16 sps:$4 sm:$0xff]  }
 0x135   :  { %v2434_v63 = vld [vmem:[#allocation5 + $0x38c] ss:$16 sps:$4 sm:$0xff]   ;;  %v2429_v0 = vld [vmem:[#allocation5 + $0x380] ss:$16 sps:$4 sm:$0xff]   ;;  %v2444_v9 = vld [vmem:[#allocation5 + $0x3c8] ss:$16 sps:$4 sm:$0xff]  }
 0x136   :  { %1217 = vmatprep.mubr.bf16.mxu0 %v392_v58  ;;  %1303 = vmatprep.mubr.bf16.mxu1 %v392_v58  ;;  %v2425_v58 = vld [vmem:[#allocation5 + $0x364] ss:$16 sps:$4 sm:$0xff]   ;;  %v2446_v7 = vld [vmem:[#allocation5 + $0x3cc] ss:$16 sps:$4 sm:$0xff]   ;;  %v2441_v8 = vld [vmem:[#allocation5 + $0x3c0] ss:$16 sps:$4 sm:$0xff]  }
 0x137   :  { %1218 = vmatmul.mubr.bf16.vlgmr.msra.gmra.mrb[4].mxu0 %v391_v57  ;;  %1304 = vmatmul.mubr.bf16.vlgmr.msra.gmra.mrb[4].mxu1 %v391_v57  ;;  %v2420_v57 = vld [vmem:[#allocation5 + $0x348] ss:$16 sps:$4 sm:$0xff]   ;;  %v2449_v10 = vld [vmem:[#allocation5 + $0x3e4] ss:$16 sps:$4 sm:$0xff]   ;;  %v2452_v11 = vld [vmem:[#allocation5 + $0x3ec] ss:$16 sps:$4 sm:$0xff]  }
 0x138   :  { %1229 = vmatpush1.bf16.msra.mxu0 %v2357_v59  ;;  %1315 = vmatpush1.bf16.msra.mxu1 %v2360_v60  ;;  %v2428_v59 = vld [vmem:[#allocation5 + $0x36c] ss:$16 sps:$4 sm:$0xff]   ;;  %v2423_v60 = vld [vmem:[#allocation5 + $0x360] ss:$16 sps:$4 sm:$0xff]  }
 0x139   :  { %1230 = vmatprep.subr.bf16.mxu0 %v2365_v61  ;;  %1316 = vmatprep.subr.bf16.mxu1 %v2368_v62  ;;  %v2426_v61 = vld [vmem:[#allocation5 + $0x368] ss:$16 sps:$4 sm:$0xff]   ;;  %v2431_v62 = vld [vmem:[#allocation5 + $0x384] ss:$16 sps:$4 sm:$0xff]   ;;  %v2447_v12 = vld [vmem:[#allocation5 + $0x3e0] ss:$16 sps:$4 sm:$0xff]  }
 0x13a   :  { %1260 = vmatprep.mubr.bf16.mxu0 %v394_v24  ;;  %1346 = vmatprep.mubr.bf16.mxu1 %v394_v24  ;;  %v2454_v15 = vld [vmem:[#allocation7 + $0xc0] sm:$0xff]   ;;  %v2458_v19 = vld [vmem:[#allocation7 + $0xc8] sm:$0xff]   ;;  %v2462_v24 = vld [vmem:[#allocation7 + $0xd0] sm:$0xff]  }
 0x13b   :  { %v2455_v16 = vld [vmem:[#allocation7] sm:$0xff]   ;;  %v2459_v20 = vld [vmem:[#allocation7 + $0x8] sm:$0xff]  }
 0x13c   :  { %1231 = vmatpush1.bf16.msra.mxu0 %v2363_v1  ;;  %1317 = vmatpush1.bf16.msra.mxu1 %v2366_v2  ;;  %v2432_v1 = vld [vmem:[#allocation5 + $0x388] ss:$16 sps:$4 sm:$0xff]   ;;  %v2437_v2 = vld [vmem:[#allocation5 + $0x3a4] ss:$16 sps:$4 sm:$0xff]  }
 0x13d   :  { %1232 = vmatprep.subr.bf16.mxu0 %v2371_v4  ;;  %1318 = vmatprep.subr.bf16.mxu1 %v2374_v5  ;;  %v2435_v4 = vld [vmem:[#allocation5 + $0x3a0] ss:$16 sps:$4 sm:$0xff]   ;;  %v2438_v5 = vld [vmem:[#allocation5 + $0x3a8] ss:$16 sps:$4 sm:$0xff]  }
 0x140   :  { %1233 = vmatpush1.bf16.msra.mxu0 %v2369_v13  ;;  %1319 = vmatpush1.bf16.msra.mxu1 %v2372_v14  ;;  %v2450_v13 = vld [vmem:[#allocation5 + $0x3e8] ss:$16 sps:$4 sm:$0xff]   ;;  %v2453_v14 = vld [vmem:[#allocation7 + $0x40] sm:$0xff]  }
 0x141   :  { %1234 = vmatprep.subr.bf16.mxu0 %v2377_v17  ;;  %1320 = vmatprep.subr.bf16.mxu1 %v2380_v18  ;;  %v2456_v17 = vld [vmem:[#allocation7 + $0x80] sm:$0xff]   ;;  %v2457_v18 = vld [vmem:[#allocation7 + $0x48] sm:$0xff]  }
 0x144   :  { %1235 = vmatpush1.bf16.msra.mxu0 %v2375_v22  ;;  %1321 = vmatpush1.bf16.msra.mxu1 %v2378_v23  ;;  %v2460_v22 = vld [vmem:[#allocation7 + $0x88] sm:$0xff]   ;;  %v2461_v23 = vld [vmem:[#allocation7 + $0x50] sm:$0xff]  }
 0x145   :  { %1236 = vmatprep.subr.bf16.mxu0 %v2383_v25  ;;  %1322 = vmatprep.subr.bf16.mxu1 %v2386_v26  ;;  %v2463_v25 = vld [vmem:[#allocation7 + $0x10] sm:$0xff]   ;;  %v2465_v26 = vld [vmem:[#allocation7 + $0x58] sm:$0xff]  }
 0x148   :  { %1237 = vmatpush1.bf16.msra.mxu0 %v2381_v27  ;;  %1323 = vmatpush1.bf16.msra.mxu1 %v2384_v28  ;;  %v2466_v27 = vld [vmem:[#allocation7 + $0xd8] sm:$0xff]  }
 0x149   :  { %1238 = vmatprep.subr.bf16.mxu0 %v2389_v29  ;;  %1324 = vmatprep.subr.bf16.mxu1 %v2392_v30  ;;  %v2467_v28 = vld [vmem:[#allocation7 + $0x18] sm:$0xff]   ;;  %v2469_v30 = vld [vmem:[#allocation7 + $0x60] sm:$0xff]  }
 0x14a   :  { %v2468_v29 = vld [vmem:[#allocation7 + $0x98] sm:$0xff]  }
 0x14c   :  { %1239 = vmatpush1.bf16.msra.mxu0 %v2387_v31  ;;  %1325 = vmatpush1.bf16.msra.mxu1 %v2390_v32  ;;  %v2470_v31 = vld [vmem:[#allocation7 + $0xe0] sm:$0xff]  }
 0x14d   :  { %1240 = vmatprep.subr.bf16.mxu0 %v2395_v33  ;;  %1326 = vmatprep.subr.bf16.mxu1 %v2398_v34  ;;  %v2471_v32 = vld [vmem:[#allocation7 + $0x20] sm:$0xff]   ;;  %v2473_v34 = vld [vmem:[#allocation7 + $0x68] sm:$0xff]  }
 0x14e   :  { %v2472_v33 = vld [vmem:[#allocation7 + $0xa0] sm:$0xff]  }
 0x150   :  { %1241 = vmatpush1.bf16.msra.mxu0 %v2393_v35  ;;  %1327 = vmatpush1.bf16.msra.mxu1 %v2396_v36  ;;  %v2474_v35 = vld [vmem:[#allocation7 + $0xe8] sm:$0xff]  }
 0x151   :  { %1242 = vmatprep.subr.bf16.mxu0 %v2401_v39  ;;  %1328 = vmatprep.subr.bf16.mxu1 %v2404_v41  ;;  %v2475_v36 = vld [vmem:[#allocation7 + $0x28] sm:$0xff]   ;;  %v2477_v41 = vld [vmem:[#allocation7 + $0x70] sm:$0xff]  }
 0x152   :  { %v2476_v39 = vld [vmem:[#allocation7 + $0xa8] sm:$0xff]  }
 0x154   :  { %1243 = vmatpush1.bf16.msra.mxu0 %v2399_v42  ;;  %1329 = vmatpush1.bf16.msra.mxu1 %v2402_v43  ;;  %v2478_v42 = vld [vmem:[#allocation7 + $0xf0] sm:$0xff]  }
 0x155   :  { %1244 = vmatprep.subr.bf16.mxu0 %v2407_v44  ;;  %1330 = vmatprep.subr.bf16.mxu1 %v2410_v45  ;;  %v2479_v43 = vld [vmem:[#allocation7 + $0x30] sm:$0xff]   ;;  %v2481_v45 = vld [vmem:[#allocation7 + $0x78] sm:$0xff]  }
 0x156   :  { %v2480_v44 = vld [vmem:[#allocation7 + $0xb0] sm:$0xff]  }
 0x158   :  { %1245 = vmatpush1.bf16.msra.mxu0 %v2405_v46  ;;  %1331 = vmatpush1.bf16.msra.mxu1 %v2408_v47  ;;  %v2482_v46 = vld [vmem:[#allocation7 + $0xf8] sm:$0xff]  }
 0x159   :  { %1246 = vmatprep.subr.bf16.mxu0 %v2413_v48  ;;  %1332 = vmatprep.subr.bf16.mxu1 %v2416_v49  ;;  %v2483_v47 = vld [vmem:[#allocation7 + $0x38] sm:$0xff]   ;;  %v523_v49 = vld [vmem:[%s2809_s4] sm:$0xf] }
 0x15a   :  { %v2484_v48 = vld [vmem:[#allocation7 + $0xb8] sm:$0xff]  }
 0x15c   :  { %1247 = vmatpush1.bf16.msra.mxu0 %v2411_v50  ;;  %1333 = vmatpush1.bf16.msra.mxu1 %v2414_v51  ;;  %v528_v50 = vrot.slane %v523_v49, %v2698_v38  ;;  %v536_v51 = vrot.slane %v523_v49, %v2709_v53 }
 0x15d   :  { %1248 = vmatprep.subr.bf16.mxu0 %v2419_v52  ;;  %1334 = vmatprep.subr.bf16.mxu1 %v2422_v54  ;;  %v532_v52 = vrot.slane %v523_v49, %v2704_v40  ;;  %v540_v54 = vrot.slane %v523_v49, %v2712_v56 }
 0x160   :  { %1249 = vmatpush1.bf16.msra.mxu0 %v2417_v55  ;;  %1335 = vmatpush1.bf16.msra.mxu1 %v2420_v57 }
 0x161   :  { %1250 = vmatprep.subr.bf16.mxu0 %v2425_v58  ;;  %1336 = vmatprep.subr.bf16.mxu1 %v2428_v59 }
 0x164   :  { %1251 = vmatpush1.bf16.msra.mxu0 %v2423_v60  ;;  %1337 = vmatpush1.bf16.msra.mxu1 %v2426_v61 }
 0x165   :  { %1252 = vmatprep.subr.bf16.mxu0 %v2431_v62  ;;  %1338 = vmatprep.subr.bf16.mxu1 %v2434_v63 }
 0x168   :  { %1253 = vmatpush1.bf16.msra.mxu0 %v2429_v0  ;;  %1339 = vmatpush1.bf16.msra.mxu1 %v2432_v1 }
 0x169   :  { %1254 = vmatprep.subr.bf16.mxu0 %v2437_v2  ;;  %1340 = vmatprep.subr.bf16.mxu1 %v2440_v3 }
 0x16c   :  { %1255 = vmatpush1.bf16.msra.mxu0 %v2435_v4  ;;  %1341 = vmatpush1.bf16.msra.mxu1 %v2438_v5 }
 0x16d   :  { %1256 = vmatprep.subr.bf16.mxu0 %v2443_v6  ;;  %1342 = vmatprep.subr.bf16.mxu1 %v2446_v7 }
 0x170   :  { %1257 = vmatpush1.bf16.msra.mxu0 %v2441_v8  ;;  %1343 = vmatpush1.bf16.msra.mxu1 %v2444_v9 }
 0x171   :  { %1258 = vmatprep.subr.bf16.mxu0 %v2449_v10  ;;  %1344 = vmatprep.subr.bf16.mxu1 %v2452_v11 }
 0x174   :  { %1259 = vmatpush1.bf16.msra.mxu0 %v2447_v12  ;;  %1345 = vmatpush1.bf16.msra.mxu1 %v2450_v13 }
 0x175   :  { %2140 = vmatprep.subr.bf16.mxu0 %v2453_v14  ;;  %2162 = vmatprep.subr.bf16.mxu1 %v2454_v15 }
 0x177   :  { %1261 = vmatmul.mubr.bf16.vlgmr.msra.gmra.mrb[4].mxu0 %v2716_v21  ;;  %1347 = vmatmul.mubr.bf16.vlgmr.msra.gmra.mrb[4].mxu1 %v2716_v21  ;;  %v2464_v21 = vld [vmem:[#allocation7 + $0x90] sm:$0xff]  }
 0x178   :  { %2141 = vmatpush3.bf16.msra.mxu0 %v2455_v16  ;;  %2163 = vmatpush3.bf16.msra.mxu1 %v2456_v17 }
 0x179   :  { %2142 = vmatprep.subr.bf16.mxu0 %v2457_v18  ;;  %2164 = vmatprep.subr.bf16.mxu1 %v2458_v19 }
 0x17c   :  { %2143 = vmatpush3.bf16.msra.mxu0 %v2459_v20  ;;  %2165 = vmatpush3.bf16.msra.mxu1 %v2460_v22 }
 0x17d   :  { %2144 = vmatprep.subr.bf16.mxu0 %v2461_v23  ;;  %2166 = vmatprep.subr.bf16.mxu1 %v2462_v24 }
 0x180   :  { %2145 = vmatpush3.bf16.msra.mxu0 %v2463_v25  ;;  %2167 = vmatpush3.bf16.msra.mxu1 %v2464_v21 }
 0x181   :  { %2146 = vmatprep.subr.bf16.mxu0 %v2465_v26  ;;  %2168 = vmatprep.subr.bf16.mxu1 %v2466_v27 }
 0x184   :  { %2147 = vmatpush3.bf16.msra.mxu0 %v2467_v28  ;;  %2169 = vmatpush3.bf16.msra.mxu1 %v2468_v29 }
 0x185   :  { %2148 = vmatprep.subr.bf16.mxu0 %v2469_v30  ;;  %2170 = vmatprep.subr.bf16.mxu1 %v2470_v31 }
 0x188   :  { %2149 = vmatpush3.bf16.msra.mxu0 %v2471_v32  ;;  %2171 = vmatpush3.bf16.msra.mxu1 %v2472_v33 }
 0x189   :  { %2150 = vmatprep.subr.bf16.mxu0 %v2473_v34  ;;  %2172 = vmatprep.subr.bf16.mxu1 %v2474_v35 }
 0x18c   :  { %2151 = vmatpush3.bf16.msra.mxu0 %v2475_v36  ;;  %2173 = vmatpush3.bf16.msra.mxu1 %v2476_v39 }
 0x18d   :  { %2152 = vmatprep.subr.bf16.mxu0 %v2477_v41  ;;  %2174 = vmatprep.subr.bf16.mxu1 %v2478_v42 }
 0x190   :  { %2153 = vmatpush3.bf16.msra.mxu0 %v2479_v43  ;;  %2175 = vmatpush3.bf16.msra.mxu1 %v2480_v44 }
 0x191   :  { %2154 = vmatprep.subr.bf16.mxu0 %v2481_v45  ;;  %2176 = vmatprep.subr.bf16.mxu1 %v2482_v46 }
 0x194   :  { %2155 = vmatpush3.bf16.msra.mxu0 %v2483_v47  ;;  %2177 = vmatpush3.bf16.msra.mxu1 %v2484_v48 }
 0x24a   :  { %v1262_v55 = vpop.f32.mrb[4].mxu0  ;;  %v1348_v57 = vpop.f32.mrb[4].mxu1 }
 0x24b   :  { %v2727_v58 = vadd.f32 %v1262_v55, %v528_v50  ;;  %v2729_v59 = vadd.f32 %v1348_v57, %v536_v51  ;;  %v1264_v60 = vpop.f32.mrb[5].mxu0  ;;  %v1350_v61 = vpop.f32.mrb[5].mxu1 }
 0x24c   :  { %v2731_v62 = vadd.f32 %v1264_v60, %v532_v52  ;;  %v2733_v63 = vadd.f32 %v1350_v61, %v540_v54  ;;  %v1266_v0 = vpop.f32.mrb[6].mxu0  ;;  %v1352_v1 = vpop.f32.mrb[6].mxu1 }
 0x24d   :  { %v1385_v2 = vmul.f32 %v2727_v58, %v2727_v58  ;;  %v1387_v3 = vmul.f32 %v2729_v59, %v2729_v59  ;;  %v2739_v4 = vadd.f32 %v1266_v0, %v528_v50  ;;  %v2741_v5 = vadd.f32 %v1352_v1, %v536_v51  ;;  %v1268_v6 = vpop.f32.mrb[7].mxu0  ;;  %v1354_v7 = vpop.f32.mrb[7].mxu1 }
 0x24e   :  { %v1386_v8 = vmul.f32 %v2731_v62, %v2731_v62  ;;  %v1388_v9 = vmul.f32 %v2733_v63, %v2733_v63  ;;  %v2747_v10 = vadd.f32 %v1268_v6, %v532_v52  ;;  %v2749_v11 = vadd.f32 %v1354_v7, %v540_v54 }
 0x24f   :  { %v1357_v12 = vadd.f32 %v2739_v4, %v2727_v58  ;;  %v1389_v13 = vmul.f32 %v2739_v4, %v2739_v4  ;;  %v1371_v14 = vadd.f32 %v2741_v5, %v2729_v59  ;;  %v1391_v15 = vmul.f32 %v2741_v5, %v2741_v5 }
 0x250   :  { %v1364_v16 = vadd.f32 %v2747_v10, %v2731_v62  ;;  %v1390_v17 = vmul.f32 %v2747_v10, %v2747_v10  ;;  %v1378_v18 = vadd.f32 %v2749_v11, %v2733_v63  ;;  %v1392_v19 = vmul.f32 %v2749_v11, %v2749_v11 }
 0x251   :  { %v1358_v20 = vrot.slane %v1357_v12, 4  ;;  %v1393_v22 = vadd.f32 %v1389_v13, %v1385_v2  ;;  %v1372_v23 = vrot.slane %v1371_v14, 4  ;;  %v1407_v24 = vadd.f32 %v1391_v15, %v1387_v3 }
 0x252   :  { %v1365_v25 = vrot.slane %v1364_v16, 4  ;;  %v1400_v21 = vadd.f32 %v1390_v17, %v1386_v8  ;;  %v1379_v26 = vrot.slane %v1378_v18, 4  ;;  %v1414_v27 = vadd.f32 %v1392_v19, %v1388_v9 }
 0x253   :  { %v1359_v28 = vadd.f32 %v1358_v20, %v1357_v12  ;;  %v1394_v29 = vrot.slane %v1393_v22, 4  ;;  %v1373_v30 = vadd.f32 %v1372_v23, %v1371_v14  ;;  %v1408_v31 = vrot.slane %v1407_v24, 4 }
 0x254   :  { %v1366_v32 = vadd.f32 %v1365_v25, %v1364_v16  ;;  %v1401_v33 = vrot.slane %v1400_v21, 4  ;;  %v1380_v34 = vadd.f32 %v1379_v26, %v1378_v18  ;;  %v1415_v35 = vrot.slane %v1414_v27, 4 }
 0x255   :  { %v1360_v36 = vrot.slane %v1359_v28, 2  ;;  %v1395_v39 = vadd.f32 %v1394_v29, %v1393_v22  ;;  %v1374_v41 = vrot.slane %v1373_v30, 2  ;;  %v1409_v42 = vadd.f32 %v1408_v31, %v1407_v24 }
 0x256   :  { %v1367_v43 = vrot.slane %v1366_v32, 2  ;;  %v1402_v44 = vadd.f32 %v1401_v33, %v1400_v21  ;;  %v1381_v45 = vrot.slane %v1380_v34, 2  ;;  %v1416_v46 = vadd.f32 %v1415_v35, %v1414_v27 }
 0x257   :  { %v1361_v47 = vadd.f32 %v1360_v36, %v1359_v28  ;;  %v1396_v48 = vrot.slane %v1395_v39, 2  ;;  %v1375_v49 = vadd.f32 %v1374_v41, %v1373_v30  ;;  %v1410_v50 = vrot.slane %v1409_v42, 2 }
 0x258   :  { %v1368_v51 = vadd.f32 %v1367_v43, %v1366_v32  ;;  %v1403_v52 = vrot.slane %v1402_v44, 2  ;;  %v1382_v54 = vadd.f32 %v1381_v45, %v1380_v34  ;;  %v1417_v55 = vrot.slane %v1416_v46, 2 }
 0x259   :  { %v1362_v57 = vrot.slane %v1361_v47, 1  ;;  %v1397_v60 = vadd.f32 %v1396_v48, %v1395_v39  ;;  %v1376_v61 = vrot.slane %v1375_v49, 1  ;;  %v1411_v0 = vadd.f32 %v1410_v50, %v1409_v42 }
 0x25a   :  { %v1369_v1 = vrot.slane %v1368_v51, 1  ;;  %v1404_v2 = vadd.f32 %v1403_v52, %v1402_v44  ;;  %v1383_v3 = vrot.slane %v1382_v54, 1  ;;  %v1418_v6 = vadd.f32 %v1417_v55, %v1416_v46 }
 0x25b   :  { %v1363_v7 = vadd.f32 %v1362_v57, %v1361_v47  ;;  %v1398_v8 = vrot.slane %v1397_v60, 1  ;;  %v1377_v9 = vadd.f32 %v1376_v61, %v1375_v49  ;;  %v1412_v12 = vrot.slane %v1411_v0, 1  ;;  %v1437_v61 = vld [vmem:[%s2810_s5] sm:$0xf] }
 0x25c   :  { %v1370_v13 = vadd.f32 %v1369_v1, %v1368_v51  ;;  %v1405_v14 = vrot.slane %v1404_v2, 1  ;;  %v1384_v15 = vadd.f32 %v1383_v3, %v1382_v54  ;;  %v1419_v16 = vrot.slane %v1418_v6, 1 }
 0x25d   :  { %v1399_v17 = vadd.f32 %v1398_v8, %v1397_v60  ;;  %v1421_v18 = vmul.f32 0.0625, %v1363_v7  ;;  %v1413_v19 = vadd.f32 %v1412_v12, %v1411_v0  ;;  %v1423_v20 = vmul.f32 0.0625, %v1377_v9 }
 0x25e   :  { %v1406_v22 = vadd.f32 %v1405_v14, %v1404_v2  ;;  %v1422_v23 = vmul.f32 0.0625, %v1370_v13  ;;  %v1420_v24 = vadd.f32 %v1419_v16, %v1418_v6  ;;  %v1424_v25 = vmul.f32 0.0625, %v1384_v15 }
 0x25f   :  { %v1425_v21 = vmul.f32 0.0625, %v1399_v17  ;;  %v1429_v26 = vmul.f32 %v1421_v18, %v1421_v18  ;;  %v1427_v27 = vmul.f32 0.0625, %v1413_v19  ;;  %v1431_v28 = vmul.f32 %v1423_v20, %v1423_v20 }
 0x260   :  { %v1426_v29 = vmul.f32 0.0625, %v1406_v22  ;;  %v1430_v30 = vmul.f32 %v1422_v23, %v1422_v23  ;;  %v1428_v31 = vmul.f32 0.0625, %v1420_v24  ;;  %v1432_v32 = vmul.f32 %v1424_v25, %v1424_v25 }
 0x261   :  { %v1433_v33 = vsub.f32 %v1425_v21, %v1429_v26  ;;  %v1435_v34 = vsub.f32 %v1427_v27, %v1431_v28  ;;  %v2595_v44 = vmov 1966171168  }
 0x262   :  { %v1434_v35 = vsub.f32 %v1426_v29, %v1430_v30  ;;  %v1436_v36 = vsub.f32 %v1428_v31, %v1432_v32  ;;  %v1453_v45 = vunpack.c.l.s4 %v2595_v44 }
 0x263   :  { %v1438_v39 = vadd.f32 1e-05, %v1433_v33  ;;  %v1440_v41 = vadd.f32 1e-05, %v1435_v34 }
 0x264   :  { %v1439_v42 = vadd.f32 1e-05, %v1434_v35  ;;  %v1441_v43 = vadd.f32 1e-05, %v1436_v36  ;;  %v1454_v46 = vunpack.c.0.s8 %v1453_v45 }
 0x265   :  { %2485 = vrsqrt.f32 %v1438_v39 }
 0x266   :  { %2487 = vrsqrt.f32 %v1440_v41  ;;  %v1457_v49 = vsub.s32 %v1454_v46, %v2695_v37  ;;  %v2107_v46 = vld [vmem:[%s2813_s8] ss:$0 sm:$0xff]  ;;  %s2559_s8 = scalar_lea.vmem %s1934_s3, 256 }
 0x267   :  { %2489 = vrsqrt.f32 %v1439_v42  ;;  %p2560_p10 = scmp.ne.s32.totalorder %s1934_s3, %s2559_s8  ;;  %p2565_p12 = scmp.lt.s32.totalorder %s2559_s8, %s2559_s8 }
 0x268   :  { %2491 = vrsqrt.f32 %v1441_v43 }
 0x269   :  { %p2566_p13 = por %p2565_p12, %p2564_p11 }
 0x26b   :  { %p2567_p0 = pnand %p2566_p13, %p2560_p10 }
 0x26f   :  { %v2486_v47 = vpop.eup %2485 }
 0x270   :  { %v2488_v48 = vpop.eup %2487 }
 0x271   :  { %v2490_v50 = vpop.eup %2489 }
 0x272   :  { %v2492_v51 = vpop.eup %2491  ;;  %v1450_v52 = vcombine.low %v2486_v47, %v2490_v50 }
 0x273   :  { %v1451_v54 = vcombine.low %v2488_v48, %v2492_v51 }
 0x274   :  { %v1458_v55 = vrot.slane %v1450_v52, %v1457_v49 }
 0x275   :  { %v1465_v57 = vrot.slane %v1451_v54, %v1457_v49 }
 0x277   :  { %v1466_v60 = vcombine.low %v1458_v55, %v1465_v57 }
 0x279   :  { %v1473_v0 = vrot.slane %v1466_v60, %v1457_v49 }
 0x27b   :  { %v1475_v1 = vmul.f32 %v1473_v0, %v1437_v61 }
 0x27d   :  { %v1481_v2 = vrot.slane %v1475_v1, %v2698_v38  ;;  %v1489_v3 = vrot.slane %v1475_v1, %v2709_v53  ;;  %v1493_v6 = vrot.slane %v1475_v1, %v2712_v56  ;;  %v1485_v37 = vrot.slane %v1475_v1, %v2704_v40 }
 0x27f   :  { %v1500_v7 = vmul.f32 %v1489_v3, %v1423_v20  ;;  %v1501_v8 = vmul.f32 %v1493_v6, %v1424_v25  ;;  %v1539_v9 = vmul.f32 %v2749_v11, %v1493_v6  ;;  %v1498_v12 = vmul.f32 %v1481_v2, %v1421_v18 }
 0x280   :  { %v1499_v13 = vmul.f32 %v1485_v37, %v1422_v23  ;;  %v1533_v14 = vmul.f32 %v2731_v62, %v1485_v37  ;;  %v1537_v15 = vmul.f32 %v2747_v10, %v1485_v37  ;;  %v1535_v16 = vmul.f32 %v2733_v63, %v1493_v6  ;;  %v1476_v62 = vld [vmem:[%s2811_s6] sm:$0xf] }
 0x281   :  { %v1507_v17 = vcombine.low %v1500_v7, %v1501_v8  ;;  %v1532_v19 = vmul.f32 %v2727_v58, %v1481_v2  ;;  %v1536_v22 = vmul.f32 %v2739_v4, %v1481_v2  ;;  %v1534_v24 = vmul.f32 %v2729_v59, %v1489_v3 }
 0x282   :  { %v1506_v21 = vcombine.low %v1498_v12, %v1499_v13  ;;  %v1538_v20 = vmul.f32 %v2741_v5, %v1489_v3 }
 0x283   :  { %v1521_v25 = vrot.slane %v1507_v17, %v1457_v49 }
 0x284   :  { %v1514_v11 = vrot.slane %v1506_v21, %v1457_v49 }
 0x286   :  { %v1522_v18 = vcombine.low %v1514_v11, %v1521_v25 }
 0x288   :  { %v1529_v10 = vrot.slane %v1522_v18, %v1457_v49 }
 0x28a   :  { %v1531_v23 = vsub.f32 %v1476_v62, %v1529_v10 }
 0x28c   :  { %v1548_v63 = vrot.slane %v1531_v23, %v2704_v40  ;;  %v1556_v58 = vrot.slane %v1531_v23, %v2712_v56  ;;  %v1544_v4 = vrot.slane %v1531_v23, %v2698_v38  ;;  %v1552_v59 = vrot.slane %v1531_v23, %v2709_v53 }
 0x28e   :  { %v1562_v26 = vadd.f32 %v1548_v63, %v1533_v14  ;;  %v1566_v27 = vadd.f32 %v1548_v63, %v1537_v15  ;;  %v1564_v5 = vadd.f32 %v1556_v58, %v1535_v16  ;;  %v1568_v28 = vadd.f32 %v1556_v58, %v1539_v9 }
 0x28f   :  { %v1561_v29 = vadd.f32 %v1544_v4, %v1532_v19  ;;  %v1565_v30 = vadd.f32 %v1544_v4, %v1536_v22  ;;  %v1563_v31 = vadd.f32 %v1552_v59, %v1534_v24  ;;  %v1567_v32 = vadd.f32 %v1552_v59, %v1538_v20 }
 0x290   :  { %v1570_v33 = vmax.f32 %v1562_v26, 0.0  ;;  %v1574_v34 = vmax.f32 %v1566_v27, 0.0  ;;  %v1572_v35 = vmax.f32 %v1564_v5, 0.0  ;;  %v1576_v36 = vmax.f32 %v1568_v28, 0.0 }
 0x291   :  { %v1569_v39 = vmax.f32 %v1561_v29, 0.0  ;;  %v1573_v40 = vmax.f32 %v1565_v30, 0.0  ;;  %v1571_v41 = vmax.f32 %v1563_v31, 0.0  ;;  %v1575_v56 = vmax.f32 %v1567_v32, 0.0 }
 0x292   :  { %v1578_v42 = vpack.c.bf16 %v1574_v34, %v1570_v33  ;;  %v1580_v38 = vpack.c.bf16 %v1576_v36, %v1572_v35 }
 0x293   :  { %v1577_v43 = vpack.c.bf16 %v1573_v40, %v1569_v39  ;;  %v1579_v53 = vpack.c.bf16 %v1575_v56, %v1571_v41 }
 0x294   :  { %1876 = vmatprep.mubr.bf16.mxu0 %v1578_v42  ;;  %1917 = vmatprep.mubr.bf16.mxu1 %v1580_v38 }
 0x295   :  { %1877 = vmatmul.mubr.bf16.vlgmr.msra.gmra.mrb[8].mxu0 %v1577_v43  ;;  %1918 = vmatmul.mubr.bf16.vlgmr.msra.gmra.mrb[8].mxu1 %v1579_v53 }
 0x368   :  { %v2156_v44 = vpop.f32.mrb[8].mxu0  ;;  %v2178_v45 = vpop.f32.mrb[8].mxu1 }
 0x369   :  { %v2157_v47 = vpop.f32.mrb[9].mxu0  ;;  %v2179_v48 = vpop.f32.mrb[9].mxu1 }
 0x36a   :  { %v2158_v49 = vadd.f32 %v2157_v47, %v2156_v44  ;;  %v2180_v50 = vadd.f32 %v2179_v48, %v2178_v45  ;;  %v2159_v51 = vpop.f32.mrb[10].mxu0  ;;  %v2181_v52 = vpop.f32.mrb[10].mxu1 }
 0x36b   :  { %v2160_v54 = vpop.f32.mrb[11].mxu0  ;;  %v2182_v55 = vpop.f32.mrb[11].mxu1 }
 0x36c   :  { %v1879_v57 = vadd.f32 %v2158_v49, %v2107_v46  ;;  %v2161_v60 = vadd.f32 %v2160_v54, %v2159_v51  ;;  %v2183_v61 = vadd.f32 %v2182_v55, %v2181_v52 }
 0x36e   :  { %v1920_v0 = vadd.f32 %v2180_v50, %v1879_v57  ;;  %v1882_v1 = vadd.f32 %v2161_v60, %v2107_v46 }
 0x370   :  { %1926 = vst [vmem:[#allocation8] sm:$0xff] %v1920_v0  ;;  %v1923_v2 = vadd.f32 %v2183_v61, %v1882_v1 }
 0x372   :  { %1927 = vst [vmem:[#allocation8 + $0x8] sm:$0xff] %v1923_v2 }
 0x373   :  { %2570 = shalt.err (!%p2567_p0)
}
 0x374   :  { %s2571_s15 = scalar_lea.hbm %s2814_s9, 256 }
 0x375   :  { %p2572_p1 = scmp.ne.s32.totalorder %s2814_s9, %s2571_s15  ;;  %p2575_p2 = scmp.lt.u32.totalorder %s2571_s15, %s2814_s9 }
 0x377   :  { %p2577_p3 = pnand %p2575_p2, %p2572_p1 }
 0x379   :  { %2580 = shalt.err (!%p2577_p3)
}
 0x37a   :  { %s2597_s20 = smov 128   ;;  %s2598_s23 = smov 8  }
 0x37b   :  { %1939 = dma.vmem_to_hbm [thread:$0]  %s1934_s3, 256, %s2814_s9, [#allocation4], %s2597_s20, %s2597_s20, %s2598_s23  }
 0x37c   :  { %2585 = dma.done.wait [#allocation4], 256  }
 0x37d   :  { %2586 = vsyncadd [#allocation4], 4294967040 }
 0x37e   :  { %1943 = vsyncpa [#allocation3], 1 }
 0x37f   :  { %1944 = vsyncpa [#allocation6], 1 }
 0x380   :  { %1945 = vsyncpa [#allocation4], 1 }

</bundles_post_ra>
